<compile_context>
chip_gen: v7x
topology: tpu7x:2x2x1
jax: 0.10.0
libtpu: 0.0.40
codegen_flags: <defaults>
</compile_context>

<pallas_src>
import functools

import jax
import jax.numpy as jnp
from jax.experimental import pallas as pl
from jax.experimental.pallas import tpu as pltpu


# ------------------------------- helpers -------------------------------------
def _round_up(x, m):
    return ((x + m - 1) // m) * m


def _vmem_limit_bytes():
    """Scoped-VMEM target derived from the chip's physical VMEM (3/4 of capacity,
    capped at 96 MiB). Conservative 64 MiB fallback keeps v7x (64 MiB/TC) safe."""
    cap = 64 * 1024 * 1024
    try:
        info_cap = int(pltpu.get_tpu_info().vmem_capacity_bytes)
        if info_cap > 0:
            cap = info_cap
    except Exception:
        pass
    return int(min((cap * 3) // 4, 96 * 1024 * 1024))


def _pick_row_tile(rows, tile_b, k_dim, cp, ncp, vmem_limit):
    """Rows of conv output per reduction step, sized by *lane-padded* bytes.

    Per-step working set:
      patches : TILE_B * ROWS_T * round_up(K,128) lanes * 2 B (bf16) * 2 (double buffer)
      conv/act: TILE_B * ROWS_T * CP * 4 B (f32)  * 2 (conservative: both live briefly)
    Resident : conv weight, classifier weight/bias, output block, accumulator.
    """
    kp_lanes = _round_up(k_dim, 128)
    tb8 = max(_round_up(tile_b, 8), 8)
    resident = (_round_up(k_dim, 16) * cp * 2     # conv weight (bf16, resident)
                + cp * ncp * 4                    # classifier weight (f32, resident)
                + 8 * ncp * 4                     # classifier bias (sublane-padded)
                + 2 * tb8 * ncp * 4               # output block (double-buffered)
                + tb8 * cp * 4)                   # accumulator scratch
    per_row = tile_b * (2 * kp_lanes * 2 + 2 * cp * 4)
    headroom = 2 * 1024 * 1024
    avail = max(vmem_limit - resident - headroom, per_row * 16)
    max_rows = max((avail // per_row) // 16 * 16, 16)   # bf16 sublane pack = 16
    rows16 = _round_up(rows, 16)
    if rows16 <= max_rows:
        return rows16, rows16          # single reduction step
    rows_t = int(max_rows)
    return rows_t, _round_up(rows, rows_t)


# ----------------------------- Pallas kernels ---------------------------------
def _pretrain_kernel_single(rp_ref, wc_ref, wcls_ref, bcls_ref, out_ref):
    # rp_ref:   (TILE_B, ROWS_T, K)  bf16  full im2col patches (+ constant-1 bias column)
    # wc_ref:   (K, CP)              bf16  conv weight (+ bias row)
    # wcls_ref: (CP, NCP)            f32   classifier weight, pre-scaled by 1/(H*W)
    # bcls_ref: (1, NCP)             f32   classifier bias
    # out_ref:  (TILE_B, NCP)        f32   logits (lane-dense store)
    tile_b, rows_t, kdim = rp_ref.shape
    cp = wc_ref.shape[1]
    # Tile-aligned reshape (ROWS_T % 16 == 0) -> one big MXU matmul, RHS stationary.
    rp2 = rp_ref[...].reshape(tile_b * rows_t, kdim)
    act = jnp.maximum(jnp.dot(rp2, wc_ref[...],
                              preferred_element_type=jnp.float32), 0.0)
    feat = jnp.sum(act.reshape(tile_b, rows_t, cp), axis=1)          # (TILE_B, CP)
    out_ref[...] = (jnp.dot(feat, wcls_ref[...],
                            preferred_element_type=jnp.float32) + bcls_ref[...])


def _pretrain_kernel_multi(rp_ref, wc_ref, wcls_ref, bcls_ref, out_ref, acc_ref):
    # Same as above, but the spatial sum is accumulated across the row-reduction grid
    # axis j in a VMEM scratch; classifier + store only at the last step.
    tile_b, rows_t, kdim = rp_ref.shape
    cp = wc_ref.shape[1]
    j = pl.program_id(1)

    rp2 = rp_ref[...].reshape(tile_b * rows_t, kdim)
    act = jnp.maximum(jnp.dot(rp2, wc_ref[...],
                              preferred_element_type=jnp.float32), 0.0)
    partial = jnp.sum(act.reshape(tile_b, rows_t, cp), axis=1)       # (TILE_B, CP)

    @pl.when(j == 0)
    def _init():
        acc_ref[...] = partial          # write, not read-add-write, on the first step

    @pl.when(j != 0)
    def _accum():
        acc_ref[...] = acc_ref[...] + partial

    @pl.when(j == pl.num_programs(1) - 1)
    def _finalize():
        out_ref[...] = (jnp.dot(acc_ref[...], wcls_ref[...],
                                preferred_element_type=jnp.float32) + bcls_ref[...])


# ------------------------------ JAX wrapper -----------------------------------
def pretrain_model_forward(x, w_conv, b_conv, w_cls, b_cls, k=3,
                           compute_dtype=jnp.bfloat16):
    """
    x:       [B, C_in, H, W]       (NCHW, like PyTorch)
    w_conv:  [C_mid, C_in, k, k]   (PyTorch Conv2d weight layout)
    b_conv:  [C_mid]
    w_cls:   [num_classes, C_mid]  (PyTorch Linear weight layout)
    b_cls:   [num_classes]
    returns: [B, num_classes] logits
    """
    assert k % 2 == 1, "symmetric 'same' padding assumes odd kernel size"
    B, C_in, H, W = x.shape
    C_mid = w_conv.shape[0]
    NC = w_cls.shape[0]
    pad = k // 2
    HW = H * W
    K = k * k * C_in + 1                       # +1: constant-1 column carrying the bias

    # Lane-dense padded channel dims (padding is free in vregs, stores are unmasked).
    CP = _round_up(C_mid, 128)
    NCP = _round_up(NC, 128)

    # Batch tiling: TILE_B <= 8; pad B up to a multiple of TILE_B (guards the
    # "no divisor" cliff; padded batch rows produce garbage logits we slice off).
    TILE_B = B if B <= 8 else 8
    BP = _round_up(B, TILE_B)

    # Byte-budgeted (lane-padding aware) row tiling.
    vmem_limit = _vmem_limit_bytes()
    ROWS_T, RPAD = _pick_row_tile(HW, TILE_B, K, CP, NCP, vmem_limit)
    n_j = RPAD // ROWS_T

    # --- full k^2 im2col patches + constant-1 bias column (single materialization) ----
    # rp[b, h*W + w, (dh*k + dw)*C_in + ci] = x_padded_nhwc[b, h+dh, w+dw, ci]
    xn = jnp.transpose(x, (0, 2, 3, 1))                                   # NHWC
    xp = jnp.pad(xn, ((0, 0), (pad, pad), (pad, pad), (0, 0)))
    shifts = [xp[:, dh:dh + H, dw:dw + W, :] for dh in range(k) for dw in range(k)]
    rp = jnp.stack(shifts, axis=3).reshape(B, HW, k * k * C_in)
    rp = jnp.concatenate([rp, jnp.ones((B, HW, 1), rp.dtype)], axis=-1)   # bias column
    rp = rp.astype(compute_dtype)
    # Zero padding of rows/batch is exact: padded rows have a 0 in the bias column too,
    # so conv -> 0 -> ReLU -> 0 contribution to the spatial sum.
    rp = jnp.pad(rp, ((0, BP - B), (0, RPAD - HW), (0, 0)))               # (BP, RPAD, K)

    # Conv weight (+ bias row): wc2[(dh*k+dw)*C_in + ci, co] = w_conv[co, ci, dh, dw]
    wc2 = jnp.transpose(w_conv, (2, 3, 1, 0)).reshape(k * k * C_in, C_mid)
    wc2 = jnp.concatenate([wc2, b_conv.reshape(1, C_mid).astype(wc2.dtype)], axis=0)
    wc2 = jnp.pad(wc2, ((0, 0), (0, CP - C_mid))).astype(compute_dtype)   # (K, CP)

    # Classifier weight with the spatial mean folded in: mean(act)@W == sum(act)@(W/HW).
    wcl = jnp.pad(w_cls.T.astype(jnp.float32) / float(HW),
                  ((0, CP - C_mid), (0, NCP - NC)))                       # (CP, NCP)
    bcl = jnp.pad(b_cls.astype(jnp.float32), (0, NCP - NC)).reshape(1, NCP)

    if n_j == 1:
        # Single reduction step: no accumulator scratch, no pl.when phases.
        kernel = _pretrain_kernel_single
        grid = (BP // TILE_B,)
        in_specs = [
            # TODO(synk): on v5e, if the patch DMA is exposed, try pipeline_mode=pl.Buffered(3) here.
            pl.BlockSpec((TILE_B, ROWS_T, K), lambda i: (i, 0, 0)),
            pl.BlockSpec((K, CP), lambda i: (0, 0)),
            pl.BlockSpec((CP, NCP), lambda i: (0, 0)),
            pl.BlockSpec((1, NCP), lambda i: (0, 0)),
        ]
        out_specs = pl.BlockSpec((TILE_B, NCP), lambda i: (i, 0))
        scratch = []
        dims = ("parallel",)
    else:
        kernel = _pretrain_kernel_multi
        grid = (BP // TILE_B, n_j)
        in_specs = [
            pl.BlockSpec((TILE_B, ROWS_T, K), lambda i, j: (i, j, 0)),
            # weights / biases: constant block index -> resident, not re-DMA'd per step
            pl.BlockSpec((K, CP), lambda i, j: (0, 0)),
            pl.BlockSpec((CP, NCP), lambda i, j: (0, 0)),
            pl.BlockSpec((1, NCP), lambda i, j: (0, 0)),
        ]
        # constant along the reduction axis j -> resident output, written at the last step
        out_specs = pl.BlockSpec((TILE_B, NCP), lambda i, j: (i, 0))
        scratch = [pltpu.VMEM((TILE_B, CP), jnp.float32)]
        dims = ("parallel", "arbitrary")

    out_padded = pl.pallas_call(
        kernel,
        out_shape=jax.ShapeDtypeStruct((BP, NCP), jnp.float32),
        grid_spec=pltpu.PrefetchScalarGridSpec(
            num_scalar_prefetch=0,
            grid=grid,
            in_specs=in_specs,
            out_specs=out_specs,
            scratch_shapes=scratch,
        ),
        compiler_params=pltpu.CompilerParams(
            dimension_semantics=dims,
            vmem_limit_bytes=vmem_limit,
        ),
    )(rp, wc2, wcl, bcl)

    return out_padded[:B, :NC]


# ------------------------- reference (pure JAX) --------------------------------
def _reference_forward(x, w_conv, b_conv, w_cls, b_cls, k=3, cast_dtype=None):
    B, C_in, H, W = x.shape
    C_mid = w_conv.shape[0]
    pad = k // 2
    if cast_dtype is not None:  # mirror the kernel's input quantization (incl. bias row)
        x = x.astype(cast_dtype).astype(jnp.float32)
        w_conv = w_conv.astype(cast_dtype).astype(jnp.float32)
        b_conv = b_conv.astype(cast_dtype).astype(jnp.float32)
    xp = jnp.pad(x, ((0, 0), (0, 0), (pad, pad), (pad, pad)))
    shifts = []
    for dh in range(k):
        for dw in range(k):
            shifts.append(xp[:, :, dh:dh + H, dw:dw + W])
    p = jnp.stack(shifts, axis=-1)                                # (B, C, H, W, k*k)
    p = p.transpose(0, 2, 3, 1, 4).reshape(B, H * W, C_in * k * k)
    wc = w_conv.reshape(C_mid, -1).T                              # (C_in*k*k, C_mid)
    conv = p @ wc + b_conv[None, None, :]
    act = jnp.maximum(conv, 0.0)
    feat = act.mean(axis=1)
    return feat @ w_cls.T + b_cls[None, :]


if __name__ == "__main__":
    # Small, deterministic setup.
    B, C_in, H, W = 2, 4, 16, 16
    C_mid, num_classes, K = 32, 8, 3

    key = jax.random.PRNGKey(0)
    kx, kwc, kbc, kwl, kbl = jax.random.split(key, 5)

    x = jax.random.normal(kx, (B, C_in, H, W), dtype=jnp.float32)
    w_conv = 0.1 * jax.random.normal(kwc, (C_mid, C_in, K, K), dtype=jnp.float32)
    b_conv = 0.1 * jax.random.normal(kbc, (C_mid,), dtype=jnp.float32)
    w_cls = 0.1 * jax.random.normal(kwl, (num_classes, C_mid), dtype=jnp.float32)
    b_cls = 0.1 * jax.random.normal(kbl, (num_classes,), dtype=jnp.float32)

    fwd = jax.jit(pretrain_model_forward, static_argnames=("k",))
    out = fwd(x, w_conv, b_conv, w_cls, b_cls, k=K)
    out = jax.block_until_ready(out)
    assert out.shape == (B, num_classes)

    # Tight check vs a reference using the same bf16-rounded inputs (kernel math is f32
    # accumulation of bf16 products), and a looser check vs the full-f32 reference.
    ref_bf16 = _reference_forward(x, w_conv, b_conv, w_cls, b_cls, k=K,
                                  cast_dtype=jnp.bfloat16)
    ref_f32 = _reference_forward(x, w_conv, b_conv, w_cls, b_cls, k=K)
    assert jnp.allclose(out, ref_bf16, atol=1e-3, rtol=1e-3), "mismatch vs bf16-consistent reference"
    assert jnp.allclose(out, ref_f32, atol=2e-2, rtol=2e-2), "mismatch vs f32 reference"

    print("KERNEL_OK")
</pallas_src>

<mosaic_0001>
module attributes {stable_mosaic.version = 11 : i64} {
  func.func @_pretrain_kernel_single(%arg0: i32, %arg1: memref<2x256x37xbf16, #tpu.memory_space<vmem>>, %arg2: memref<37x128xbf16, #tpu.memory_space<vmem>>, %arg3: memref<128x128xf32, #tpu.memory_space<vmem>>, %arg4: memref<1x128xf32, #tpu.memory_space<vmem>>, %arg5: memref<2x128xf32, #tpu.memory_space<vmem>>) attributes {dimension_semantics = [#tpu.dimension_semantics<parallel>], iteration_bounds = array<i64: 1>, scalar_prefetch = 0 : i64, scratch_operands = 0 : i64, tpu.core_type = #tpu.core_type<tc>, window_params = [{transform_indices = @transform_0, window_bounds = array<i64: 2, 256, 37>}, {pipeline_mode = #tpu.pipeline_mode<synchronous>, transform_indices = @transform_1, window_bounds = array<i64: 37, 128>}, {pipeline_mode = #tpu.pipeline_mode<synchronous>, transform_indices = @transform_2, window_bounds = array<i64: 128, 128>}, {pipeline_mode = #tpu.pipeline_mode<synchronous>, transform_indices = @transform_3, window_bounds = array<i64: 1, 128>}, {transform_indices = @transform_4, window_bounds = array<i64: 2, 128>}]} {
    %c0 = arith.constant 0 : index
    %c0_0 = arith.constant 0 : index
    %c0_1 = arith.constant 0 : index
    %0 = vector.load %arg1[%c0, %c0_0, %c0_1] : memref<2x256x37xbf16, #tpu.memory_space<vmem>>, vector<2x256x37xbf16>
    %1 = vector.shape_cast %0 : vector<2x256x37xbf16> to vector<512x37xbf16>
    %c0_2 = arith.constant 0 : index
    %c0_3 = arith.constant 0 : index
    %2 = vector.load %arg2[%c0_2, %c0_3] : memref<37x128xbf16, #tpu.memory_space<vmem>>, vector<37x128xbf16>
    %cst = arith.constant dense<0.000000e+00> : vector<512x128xf32>
    %3 = tpu.matmul %1, %2, %cst {dimension_numbers = #tpu.dot_dimension_numbers<[1], [0], [0], [1], [0, 0, 1, 1], [], []>} : vector<512x37xbf16>, vector<37x128xbf16>, vector<512x128xf32> -> vector<512x128xf32>
    %cst_4 = arith.constant 0.000000e+00 : f32
    %4 = vector.broadcast %cst_4 : f32 to vector<512x128xf32>
    %5 = arith.maximumf %3, %4 : vector<512x128xf32>
    %6 = vector.shape_cast %5 : vector<512x128xf32> to vector<2x256x128xf32>
    %cst_5 = arith.constant dense<0.000000e+00> : vector<2x128xf32>
    %7 = vector.multi_reduction <add>, %6, %cst_5 [1] : vector<2x256x128xf32> to vector<2x128xf32>
    %c0_6 = arith.constant 0 : index
    %c0_7 = arith.constant 0 : index
    %8 = vector.load %arg3[%c0_6, %c0_7] : memref<128x128xf32, #tpu.memory_space<vmem>>, vector<128x128xf32>
    %cst_8 = arith.constant dense<0.000000e+00> : vector<2x128xf32>
    %9 = tpu.matmul %7, %8, %cst_8 {dimension_numbers = #tpu.dot_dimension_numbers<[1], [0], [0], [1], [0, 0, 1, 1], [], []>} : vector<2x128xf32>, vector<128x128xf32>, vector<2x128xf32> -> vector<2x128xf32>
    %c0_9 = arith.constant 0 : index
    %c0_10 = arith.constant 0 : index
    %10 = vector.load %arg4[%c0_9, %c0_10] : memref<1x128xf32, #tpu.memory_space<vmem>>, vector<1x128xf32>
    %11 = vector.broadcast %10 : vector<1x128xf32> to vector<2x128xf32>
    %12 = arith.addf %9, %11 : vector<2x128xf32>
    %c0_11 = arith.constant 0 : index
    %c0_12 = arith.constant 0 : index
    %13 = vector.load %arg5[%c0_11, %c0_12] : memref<2x128xf32, #tpu.memory_space<vmem>>, vector<2x128xf32>
    tpu.vector_store %arg5[%c0_11, %c0_12], %12 {strides = array<i32>} : memref<2x128xf32, #tpu.memory_space<vmem>>, vector<2x128xf32>,
    return
  }
  func.func @transform_0(%arg0: i32) -> (i32, i32, i32) {
    %c0_i32 = arith.constant 0 : i32
    %c0_i32_0 = arith.constant 0 : i32
    %c0_i32_1 = arith.constant 0 : i32
    return %arg0, %c0_i32, %c0_i32_0 : i32, i32, i32
  }
  func.func @transform_1(%arg0: i32) -> (i32, i32) {
    %c0_i32 = arith.constant 0 : i32
    %c0_i32_0 = arith.constant 0 : i32
    %c0_i32_1 = arith.constant 0 : i32
    return %c0_i32, %c0_i32_0 : i32, i32
  }
  func.func @transform_2(%arg0: i32) -> (i32, i32) {
    %c0_i32 = arith.constant 0 : i32
    %c0_i32_0 = arith.constant 0 : i32
    %c0_i32_1 = arith.constant 0 : i32
    return %c0_i32, %c0_i32_0 : i32, i32
  }
  func.func @transform_3(%arg0: i32) -> (i32, i32) {
    %c0_i32 = arith.constant 0 : i32
    %c0_i32_0 = arith.constant 0 : i32
    %c0_i32_1 = arith.constant 0 : i32
    return %c0_i32, %c0_i32_0 : i32, i32
  }
  func.func @transform_4(%arg0: i32) -> (i32, i32) {
    %c0_i32 = arith.constant 0 : i32
    %c0_i32_0 = arith.constant 0 : i32
    return %arg0, %c0_i32 : i32, i32
  }
}

</mosaic_0001>

<bundles_post_ra>
// kernel: pretrain_model_forward.1
= control target key start
LH: loop header
LB: loop body
LE: loop exit
PB: predicated region body
PF: predicated region fallthrough
CT: control target
= control target key end

     0   :  { %vm360_vm0 = vcmask 1041408   ;;  %vm361_vm1 = vcmask 1042432   ;;  %v1226_v3 = vmov 65535   ;;  %vm263_vm2 = vcmask 302080   ;;  %s1540_s0 = inlined_call_operand.vmem [shape: bf16[2,256,37], index: 0, kind: input, shape index: {}]   ;;  %s1541_s1 = inlined_call_operand.vmem [shape: bf16[37,128], index: 1, kind: input, shape index: {}]   ;;  %s1542_s2 = inlined_call_operand.vmem [shape: f32[128,128], index: 2, kind: input, shape index: {}]   ;;  %s1543_s3 = inlined_call_operand.vmem [shape: f32[1,128], index: 3, kind: input, shape index: {}]   ;;  %s1544_s4 = inlined_call_operand.hbm [shape: f32[2,128], index: 4, kind: output, shape index: {}]  }
   0x1   :  { %v1167_v0 = vld [vmem:[%s1541_s1] sm:$0xff]   ;;  %v1168_v1 = vld [vmem:[%s1541_s1 + $0x8] sm:$0xff]   ;;  %v1169_v2 = vld [vmem:[%s1541_s1 + $0x10] ss:$0 sps:$4 sm:$0x77]   ;;  %v362_v4 = vsel %vm360_vm0, 4294967295, %v1226_v3 }
   0x2   :  { %1027 = vmatprep.subr.bf16.mxu0 %v1167_v0  ;;  %1156 = vmatprep.subr.bf16.mxu1 %v1167_v0  ;;  %v1170_v5 = vld [vmem:[%s1540_s0] sm:$0xff]   ;;  %v363_v6 = vsel %vm361_vm1, %v362_v4, 0  ;;  %v1171_v8 = vld [vmem:[%s1540_s0 + $0x8] sm:$0xff]   ;;  %v1172_v9 = vld [vmem:[%s1540_s0 + $0x10] sm:$0xff]  }
   0x3   :  { %1028 = vmatpush3.bf16.msra.mxu0 %v1167_v0  ;;  %1159 = vmatpush3.bf16.msra.mxu1 %v1167_v0  ;;  %v365_v7 = vand.u32 %v1169_v2, %v363_v6  ;;  %v1173_v10 = vld [vmem:[%s1540_s0 + $0x18] sm:$0xff]   ;;  %v1174_v11 = vld [vmem:[%s1540_s0 + $0x20] sm:$0xff]   ;;  %v1188_v12 = vld [vmem:[%s1540_s0 + $0x90] sm:$0xff]  }
   0x4   :  { %1029 = vmatprep.subr.bf16.mxu0 %v1168_v1  ;;  %1157 = vmatprep.subr.bf16.mxu1 %v1168_v1  ;;  %v1189_v13 = vld [vmem:[%s1540_s0 + $0x98] sm:$0xff]   ;;  %v1190_v14 = vld [vmem:[%s1540_s0 + $0xa0] sm:$0xff]   ;;  %v1175_v15 = vld [vmem:[%s1540_s0 + $0x28] sm:$0xff]  }
   0x5   :  { %1033 = vmatprep.mubr.msk.bf16.mxu0 %vm263_vm2, %v1170_v5  ;;  %1069 = vmatprep.mubr.msk.bf16.mxu1 %vm263_vm2, %v1188_v12  ;;  %v1176_v16 = vld [vmem:[%s1540_s0 + $0x30] sm:$0xff]   ;;  %v1191_v17 = vld [vmem:[%s1540_s0 + $0xa8] sm:$0xff]   ;;  %v1177_v19 = vld [vmem:[%s1540_s0 + $0x38] sm:$0xff]  }
   0x6   :  { %v1192_v18 = vld [vmem:[%s1540_s0 + $0xb0] sm:$0xff]   ;;  %v1178_v20 = vld [vmem:[%s1540_s0 + $0x40] sm:$0xff]  }
   0x7   :  { %1030 = vmatpush3.bf16.msra.mxu0 %v1168_v1  ;;  %1160 = vmatpush3.bf16.msra.mxu1 %v1168_v1 }
   0x8   :  { %1031 = vmatprep.subr.bf16.mxu0 %v365_v7  ;;  %1158 = vmatprep.subr.bf16.mxu1 %v365_v7 }
   0xb   :  { %1032 = vmatpush3.bf16.msra.mxu0 %v365_v7  ;;  %1161 = vmatpush3.bf16.msra.mxu1 %v365_v7 }
   0xe   :  { %1034 = vmatmul.mubr.msk.bf16.vlgmr.msra.gmra.mrb[0].mxu0 %vm263_vm2, %v1171_v8  ;;  %1070 = vmatmul.mubr.msk.bf16.vlgmr.msra.gmra.mrb[0].mxu1 %vm263_vm2, %v1189_v13 }
   0xf   :  { %1037 = vmatprep.mubr.msk.bf16.mxu0 %vm263_vm2, %v1172_v9  ;;  %1073 = vmatprep.mubr.msk.bf16.mxu1 %vm263_vm2, %v1190_v14 }
  0x16   :  { %1038 = vmatmul.mubr.msk.bf16.gmra.mrb[4].mxu0 %vm263_vm2, %v1173_v10  ;;  %1074 = vmatmul.mubr.msk.bf16.gmra.mrb[4].mxu1 %vm263_vm2, %v1191_v17 }
  0x17   :  { %1041 = vmatprep.mubr.msk.bf16.mxu0 %vm263_vm2, %v1174_v11  ;;  %1077 = vmatprep.mubr.msk.bf16.mxu1 %vm263_vm2, %v1192_v18 }
  0x1e   :  { %1042 = vmatmul.mubr.msk.bf16.gmra.mrb[8].mxu0 %vm263_vm2, %v1175_v15 }
  0x1f   :  { %1045 = vmatprep.mubr.msk.bf16.mxu0 %vm263_vm2, %v1176_v16 }
  0x20   :  { %9 = vsyncpa [#allocation3], 0  ;;  %v1193_v21 = vld [vmem:[%s1540_s0 + $0xb8] sm:$0xff]   ;;  %v1194_v22 = vld [vmem:[%s1540_s0 + $0xc0] sm:$0xff]   ;;  %v1227_v41 = vmov 0.0|0.0   ;;  %vm1228_vm3 = vmmov 0  }
  0x21   :  { %1078 = vmatmul.mubr.msk.bf16.gmra.mrb[8].mxu1 %vm263_vm2, %v1193_v21  ;;  %v1179_v23 = vld [vmem:[%s1540_s0 + $0x48] sm:$0xff]   ;;  %v1180_v24 = vld [vmem:[%s1540_s0 + $0x50] sm:$0xff]   ;;  %v1181_v27 = vld [vmem:[%s1540_s0 + $0x58] sm:$0xff]   ;;  %1132 = vmatprep.subr.bf16.mxu1 %v1227_v41  ;;  %v1229_v17 = vmov 0.0   ;;  %vm819_vm4 = vcmask 1041409   ;;  %s1230_s9 = smov [#allocation2]  }
  0x22   :  { %1081 = vmatprep.mubr.msk.bf16.mxu1 %vm263_vm2, %v1194_v22  ;;  %v1195_v25 = vld [vmem:[%s1540_s0 + $0xc8] sm:$0xff]   ;;  %v1196_v26 = vld [vmem:[%s1540_s0 + $0xd0] sm:$0xff]   ;;  %v1182_v28 = vld [vmem:[%s1540_s0 + $0x60] sm:$0xff]  }
  0x23   :  { %v1197_v29 = vld [vmem:[%s1540_s0 + $0xd8] sm:$0xff]   ;;  %v1198_v30 = vld [vmem:[%s1540_s0 + $0xe0] sm:$0xff]   ;;  %v1183_v31 = vld [vmem:[%s1540_s0 + $0x68] sm:$0xff]  }
  0x24   :  { %v1184_v32 = vld [vmem:[%s1540_s0 + $0x70] sm:$0xff]   ;;  %v1199_v33 = vld [vmem:[%s1540_s0 + $0xe8] sm:$0xff]   ;;  %v1185_v35 = vld [vmem:[%s1540_s0 + $0x78] sm:$0xff]  }
  0x25   :  { %v1200_v34 = vld [vmem:[%s1540_s0 + $0xf0] sm:$0xff]   ;;  %v1186_v36 = vld [vmem:[%s1540_s0 + $0x80] sm:$0xff]   ;;  %v1201_v37 = vld [vmem:[%s1540_s0 + $0xf8] sm:$0xff]  }
  0x26   :  { %1046 = vmatmul.mubr.msk.bf16.gmra.mrb[12].mxu0 %vm263_vm2, %v1177_v19  ;;  %v1187_v38 = vld [vmem:[%s1540_s0 + $0x88] sm:$0xff]   ;;  %v794_v39 = vld [vmem:[%s1542_s2] sm:$0xff]  ;;  %v796_v43 = vld [vmem:[%s1542_s2 + $0x10] sm:$0xff]  ;;  %s899_s0 = sshll.u32 %s1230_s9, 4  ;;  %s900_s0 = int_to_ptr.vmem [resolvable:$true] %s899_s0 }
  0x27   :  { %1049 = vmatprep.mubr.msk.bf16.mxu0 %vm263_vm2, %v1178_v20  ;;  %v795_v40 = vld [vmem:[%s1542_s2 + $0x8] sm:$0xff]  ;;  %v797_v44 = vld [vmem:[%s1542_s2 + $0x18] sm:$0xff]  ;;  %v798_v46 = vld [vmem:[%s1542_s2 + $0x20] sm:$0xff]  ;;  %s1202_s10 = scalar_lea.vmem %s900_s0, 32  ;;  %p1207_p1 = scmp.lt.s32.totalorder %s900_s0, %s900_s0 }
  0x28   :  { %v1133_v42 = vpack.c.bf16 %v795_v40, %v794_v39  ;;  %v1136_v45 = vpack.c.bf16 %v797_v44, %v796_v43  ;;  %v799_v47 = vld [vmem:[%s1542_s2 + $0x28] sm:$0xff]  ;;  %v800_v49 = vld [vmem:[%s1542_s2 + $0x30] sm:$0xff]  ;;  %v801_v50 = vld [vmem:[%s1542_s2 + $0x38] sm:$0xff]  ;;  %p1203_p0 = scmp.ne.s32.totalorder %s900_s0, %s1202_s10  ;;  %p1208_p2 = scmp.lt.s32.totalorder %s1202_s10, %s1202_s10 }
  0x29   :  { %1082 = vmatmul.mubr.msk.bf16.gmra.mrb[12].mxu1 %vm263_vm2, %v1195_v25  ;;  %v1139_v48 = vpack.c.bf16 %v799_v47, %v798_v46  ;;  %v1142_v51 = vpack.c.bf16 %v801_v50, %v800_v49  ;;  %v802_v52 = vld [vmem:[%s1542_s2 + $0x40] sm:$0xff]  ;;  %v803_v53 = vld [vmem:[%s1542_s2 + $0x48] sm:$0xff]  ;;  %v804_v59 = vld [vmem:[%s1542_s2 + $0x50] sm:$0xff] }
  0x2a   :  { %1085 = vmatprep.mubr.msk.bf16.mxu1 %vm263_vm2, %v1196_v26  ;;  %1134 = vmatpush3.bf16.msra.mxu1 %v1133_v42  ;;  %v1145_v54 = vpack.c.bf16 %v803_v53, %v802_v52  ;;  %v805_v60 = vld [vmem:[%s1542_s2 + $0x58] sm:$0xff]  ;;  %v806_v2 = vld [vmem:[%s1542_s2 + $0x60] sm:$0xff]  ;;  %v807_v3 = vld [vmem:[%s1542_s2 + $0x68] sm:$0xff]  ;;  %p1209_p3 = por %p1208_p2, %p1207_p1 }
  0x2b   :  { %1135 = vmatprep.subr.bf16.mxu1 %v1227_v41  ;;  %v1148_v63 = vpack.c.bf16 %v805_v60, %v804_v59  ;;  %v1151_v7 = vpack.c.bf16 %v807_v3, %v806_v2  ;;  %v808_v12 = vld [vmem:[%s1542_s2 + $0x70] sm:$0xff]  ;;  %v809_v13 = vld [vmem:[%s1542_s2 + $0x78] sm:$0xff] }
  0x2c   :  { %v1154_v16 = vpack.c.bf16 %v809_v13, %v808_v12  ;;  %p1210_p4 = pnand %p1209_p3, %p1203_p0 }
  0x2e   :  { %1050 = vmatmul.mubr.msk.bf16.gmra.mrb[16].mxu0 %vm263_vm2, %v1179_v23  ;;  %1137 = vmatpush3.bf16.msra.mxu1 %v1136_v45 }
  0x2f   :  { %1053 = vmatprep.mubr.msk.bf16.mxu0 %vm263_vm2, %v1180_v24  ;;  %1138 = vmatprep.subr.bf16.mxu1 %v1227_v41 }
  0x31   :  { %1086 = vmatmul.mubr.msk.bf16.gmra.mrb[16].mxu1 %vm263_vm2, %v1197_v29 }
  0x32   :  { %1089 = vmatprep.mubr.msk.bf16.mxu1 %vm263_vm2, %v1198_v30  ;;  %1140 = vmatpush3.bf16.msra.mxu1 %v1139_v48 }
  0x33   :  { %1141 = vmatprep.subr.bf16.mxu1 %v1227_v41 }
  0x36   :  { %1054 = vmatmul.mubr.msk.bf16.gmra.mrb[20].mxu0 %vm263_vm2, %v1181_v27  ;;  %1143 = vmatpush3.bf16.msra.mxu1 %v1142_v51 }
  0x37   :  { %1057 = vmatprep.mubr.msk.bf16.mxu0 %vm263_vm2, %v1182_v28  ;;  %1144 = vmatprep.subr.bf16.mxu1 %v1227_v41 }
  0x39   :  { %1090 = vmatmul.mubr.msk.bf16.gmra.mrb[20].mxu1 %vm263_vm2, %v1199_v33 }
  0x3a   :  { %1093 = vmatprep.mubr.msk.bf16.mxu1 %vm263_vm2, %v1200_v34  ;;  %1146 = vmatpush3.bf16.msra.mxu1 %v1145_v54 }
  0x3b   :  { %1147 = vmatprep.subr.bf16.mxu1 %v1227_v41 }
  0x3e   :  { %1058 = vmatmul.mubr.msk.bf16.gmra.mrb[24].mxu0 %vm263_vm2, %v1183_v31  ;;  %1149 = vmatpush3.bf16.msra.mxu1 %v1148_v63 }
  0x3f   :  { %1061 = vmatprep.mubr.msk.bf16.mxu0 %vm263_vm2, %v1184_v32  ;;  %1150 = vmatprep.subr.bf16.mxu1 %v1227_v41 }
  0x41   :  { %1094 = vmatmul.mubr.msk.bf16.gmra.mrb[24].mxu1 %vm263_vm2, %v1201_v37 }
  0x42   :  { %1152 = vmatpush3.bf16.msra.mxu1 %v1151_v7  ;;  %1129 = vmatprep.mubr.msk.f32.mxu1 %vm1228_vm3, %v1229_v17 }
  0x43   :  { %1153 = vmatprep.subr.bf16.mxu1 %v1227_v41 }
  0x46   :  { %1062 = vmatmul.mubr.msk.bf16.gmra.mrb[28].mxu0 %vm263_vm2, %v1185_v35  ;;  %1155 = vmatpush3.bf16.msra.mxu1 %v1154_v16 }
  0x47   :  { %1065 = vmatprep.mubr.msk.bf16.mxu0 %vm263_vm2, %v1186_v36 }
  0x4e   :  { %1066 = vmatmul.mubr.msk.bf16.gmra.mrb[32].mxu0 %vm263_vm2, %v1187_v38 }
  0xe1   :  { %v1035_v55 = vpop.f32.mrb[0].mxu0  ;;  %v1441_v15 = vpop.f32.mrb[0].mxu1 }
  0xe2   :  { %v401_v56 = vpop.f32.mrb[1].mxu0  ;;  %v658_v0 = vmax.f32 %v1035_v55, 0.0  ;;  %v1443_v20 = vpop.f32.mrb[1].mxu1 }
  0xe3   :  { %v1036_v57 = vpop.f32.mrb[2].mxu0  ;;  %v656_v61 = vmax.f32 %v401_v56, 0.0  ;;  %v1445_v21 = vpop.f32.mrb[2].mxu1 }
  0xe4   :  { %v404_v58 = vpop.f32.mrb[3].mxu0  ;;  %v659_v4 = vmax.f32 %v1036_v57, 0.0  ;;  %v1447_v24 = vpop.f32.mrb[3].mxu1 }
  0xe5   :  { %v657_v62 = vmax.f32 %v404_v58, 0.0 }
  0xe7   :  { %v720_v1 = vadd.f32 %v657_v62, %v656_v61 }
  0xe9   :  { %v721_v5 = vadd.f32 %v720_v1, %v658_v0  ;;  %v1039_v6 = vpop.f32.mrb[4].mxu0  ;;  %v1449_v33 = vpop.f32.mrb[4].mxu1 }
  0xea   :  { %v417_v8 = vpop.f32.mrb[5].mxu0  ;;  %v662_v22 = vmax.f32 %v1039_v6, 0.0  ;;  %v1451_v36 = vpop.f32.mrb[5].mxu1 }
  0xeb   :  { %v660_v9 = vmax.f32 %v417_v8, 0.0  ;;  %v722_v10 = vadd.f32 %v721_v5, %v659_v4  ;;  %v1040_v11 = vpop.f32.mrb[6].mxu0  ;;  %v1453_v37 = vpop.f32.mrb[6].mxu1 }
  0xec   :  { %v420_v14 = vpop.f32.mrb[7].mxu0  ;;  %v663_v25 = vmax.f32 %v1040_v11, 0.0  ;;  %v1455_v40 = vpop.f32.mrb[7].mxu1 }
  0xed   :  { %v723_v18 = vadd.f32 %v722_v10, %v660_v9  ;;  %v661_v19 = vmax.f32 %v420_v14, 0.0 }
  0xef   :  { %v724_v23 = vadd.f32 %v723_v18, %v661_v19 }
  0xf1   :  { %v725_v26 = vadd.f32 %v724_v23, %v662_v22  ;;  %v1043_v27 = vpop.f32.mrb[8].mxu0 }
  0xf2   :  { %v433_v28 = vpop.f32.mrb[9].mxu0  ;;  %v666_v38 = vmax.f32 %v1043_v27, 0.0 }
  0xf3   :  { %v664_v29 = vmax.f32 %v433_v28, 0.0  ;;  %v726_v30 = vadd.f32 %v725_v26, %v663_v25  ;;  %v1044_v31 = vpop.f32.mrb[10].mxu0 }
  0xf4   :  { %v436_v32 = vpop.f32.mrb[11].mxu0  ;;  %v667_v41 = vmax.f32 %v1044_v31, 0.0  ;;  %v1457_v49 = vpop.f32.mrb[8].mxu1 }
  0xf5   :  { %v727_v34 = vadd.f32 %v726_v30, %v664_v29  ;;  %v665_v35 = vmax.f32 %v436_v32, 0.0  ;;  %v1459_v52 = vpop.f32.mrb[9].mxu1 }
  0xf6   :  { %v1461_v53 = vpop.f32.mrb[10].mxu1 }
  0xf7   :  { %v728_v39 = vadd.f32 %v727_v34, %v665_v35  ;;  %v1463_v56 = vpop.f32.mrb[11].mxu1 }
  0xf9   :  { %v729_v42 = vadd.f32 %v728_v39, %v666_v38  ;;  %v1047_v43 = vpop.f32.mrb[12].mxu0 }
  0xfa   :  { %v449_v44 = vpop.f32.mrb[13].mxu0  ;;  %v670_v54 = vmax.f32 %v1047_v43, 0.0 }
  0xfb   :  { %v668_v45 = vmax.f32 %v449_v44, 0.0  ;;  %v730_v46 = vadd.f32 %v729_v42, %v667_v41  ;;  %v1048_v47 = vpop.f32.mrb[14].mxu0 }
  0xfc   :  { %v452_v48 = vpop.f32.mrb[15].mxu0  ;;  %v671_v57 = vmax.f32 %v1048_v47, 0.0  ;;  %v1465_v1 = vpop.f32.mrb[12].mxu1 }
  0xfd   :  { %v731_v50 = vadd.f32 %v730_v46, %v668_v45  ;;  %v669_v51 = vmax.f32 %v452_v48, 0.0  ;;  %v1467_v4 = vpop.f32.mrb[13].mxu1 }
  0xfe   :  { %v1469_v5 = vpop.f32.mrb[14].mxu1 }
  0xff   :  { %v732_v55 = vadd.f32 %v731_v50, %v669_v51  ;;  %v1471_v8 = vpop.f32.mrb[15].mxu1 }
 0x101   :  { %v733_v58 = vadd.f32 %v732_v55, %v670_v54  ;;  %v1051_v59 = vpop.f32.mrb[16].mxu0 }
 0x102   :  { %v465_v60 = vpop.f32.mrb[17].mxu0  ;;  %v674_v6 = vmax.f32 %v1051_v59, 0.0 }
 0x103   :  { %v672_v61 = vmax.f32 %v465_v60, 0.0  ;;  %v734_v62 = vadd.f32 %v733_v58, %v671_v57  ;;  %v1052_v63 = vpop.f32.mrb[18].mxu0 }
 0x104   :  { %v468_v0 = vpop.f32.mrb[19].mxu0  ;;  %v675_v9 = vmax.f32 %v1052_v63, 0.0  ;;  %v1473_v18 = vpop.f32.mrb[16].mxu1 }
 0x105   :  { %v735_v2 = vadd.f32 %v734_v62, %v672_v61  ;;  %v673_v3 = vmax.f32 %v468_v0, 0.0  ;;  %v1475_v23 = vpop.f32.mrb[17].mxu1 }
 0x106   :  { %v1477_v25 = vpop.f32.mrb[18].mxu1 }
 0x107   :  { %v736_v7 = vadd.f32 %v735_v2, %v673_v3  ;;  %v1479_v28 = vpop.f32.mrb[19].mxu1 }
 0x109   :  { %v737_v10 = vadd.f32 %v736_v7, %v674_v6  ;;  %v1055_v11 = vpop.f32.mrb[20].mxu0 }
 0x10a   :  { %v481_v12 = vpop.f32.mrb[21].mxu0  ;;  %v678_v26 = vmax.f32 %v1055_v11, 0.0 }
 0x10b   :  { %v676_v13 = vmax.f32 %v481_v12, 0.0  ;;  %v738_v14 = vadd.f32 %v737_v10, %v675_v9  ;;  %v1056_v16 = vpop.f32.mrb[22].mxu0 }
 0x10c   :  { %v484_v17 = vpop.f32.mrb[23].mxu0  ;;  %v679_v29 = vmax.f32 %v1056_v16, 0.0  ;;  %v1481_v41 = vpop.f32.mrb[20].mxu1 }
 0x10d   :  { %v739_v19 = vadd.f32 %v738_v14, %v676_v13  ;;  %v677_v22 = vmax.f32 %v484_v17, 0.0  ;;  %v1483_v44 = vpop.f32.mrb[21].mxu1 }
 0x10e   :  { %v1485_v45 = vpop.f32.mrb[22].mxu1 }
 0x10f   :  { %v740_v27 = vadd.f32 %v739_v19, %v677_v22  ;;  %v1487_v48 = vpop.f32.mrb[23].mxu1 }
 0x111   :  { %v741_v30 = vadd.f32 %v740_v27, %v678_v26  ;;  %v1059_v31 = vpop.f32.mrb[24].mxu0 }
 0x112   :  { %v497_v32 = vpop.f32.mrb[25].mxu0  ;;  %v682_v46 = vmax.f32 %v1059_v31, 0.0 }
 0x113   :  { %v680_v34 = vmax.f32 %v497_v32, 0.0  ;;  %v742_v35 = vadd.f32 %v741_v30, %v679_v29  ;;  %v1060_v38 = vpop.f32.mrb[26].mxu0  ;;  %v692_v30 = vmax.f32 %v1443_v20, 0.0  ;;  %v699_v20 = vmax.f32 %v1453_v37, 0.0 }
 0x114   :  { %v500_v39 = vpop.f32.mrb[27].mxu0  ;;  %v683_v50 = vmax.f32 %v1060_v38, 0.0  ;;  %v1489_v61 = vpop.f32.mrb[24].mxu1  ;;  %v706_v37 = vmax.f32 %v1465_v1, 0.0 }
 0x115   :  { %v743_v42 = vadd.f32 %v742_v35, %v680_v34  ;;  %v681_v43 = vmax.f32 %v500_v39, 0.0  ;;  %v1491_v0 = vpop.f32.mrb[25].mxu1  ;;  %v693_v34 = vmax.f32 %v1447_v24, 0.0  ;;  %v694_v35 = vmax.f32 %v1441_v15, 0.0 }
 0x116   :  { %v1493_v2 = vpop.f32.mrb[26].mxu1  ;;  %v695_v39 = vmax.f32 %v1445_v21, 0.0  ;;  %v700_v24 = vmax.f32 %v1459_v52, 0.0  ;;  %v702_v21 = vmax.f32 %v1457_v49, 0.0  ;;  %v707_v52 = vmax.f32 %v1469_v5, 0.0 }
 0x117   :  { %v744_v47 = vadd.f32 %v743_v42, %v681_v43  ;;  %v1495_v7 = vpop.f32.mrb[27].mxu1  ;;  %v696_v43 = vmax.f32 %v1451_v36, 0.0  ;;  %v703_v36 = vmax.f32 %v1461_v53, 0.0  ;;  %v710_v53 = vmax.f32 %v1473_v18, 0.0 }
 0x118   :  { %v714_v5 = vmax.f32 %v1481_v41, 0.0 }
 0x119   :  { %v745_v51 = vadd.f32 %v744_v47, %v682_v46  ;;  %v1063_v54 = vpop.f32.mrb[28].mxu0 }
 0x11a   :  { %v513_v55 = vpop.f32.mrb[29].mxu0  ;;  %v686_v3 = vmax.f32 %v1063_v54, 0.0 }
 0x11b   :  { %v684_v57 = vmax.f32 %v513_v55, 0.0  ;;  %v746_v58 = vadd.f32 %v745_v51, %v683_v50  ;;  %v1064_v59 = vpop.f32.mrb[30].mxu0  ;;  %v697_v50 = vmax.f32 %v1455_v40, 0.0  ;;  %v698_v51 = vmax.f32 %v1449_v33, 0.0 }
 0x11c   :  { %v516_v60 = vpop.f32.mrb[31].mxu0  ;;  %v687_v9 = vmax.f32 %v1064_v59, 0.0  ;;  %v704_v40 = vmax.f32 %v1467_v4, 0.0  ;;  %v711_v4 = vmax.f32 %v1477_v25, 0.0  ;;  %v717_v25 = vmax.f32 %v1495_v7, 0.0 }
 0x11d   :  { %v747_v62 = vadd.f32 %v746_v58, %v684_v57  ;;  %v685_v63 = vmax.f32 %v516_v60, 0.0  ;;  %v701_v58 = vmax.f32 %v1463_v56, 0.0  ;;  %v708_v56 = vmax.f32 %v1475_v23, 0.0 }
 0x11e   :  { %v715_v23 = vmax.f32 %v1485_v45, 0.0 }
 0x11f   :  { %v748_v6 = vadd.f32 %v747_v62, %v685_v63  ;;  %v705_v63 = vmax.f32 %v1471_v8, 0.0  ;;  %v712_v8 = vmax.f32 %v1483_v44, 0.0  ;;  %v718_v44 = vmax.f32 %v1489_v61, 0.0  ;;  %v974_v61 = vld [vmem:[%s1543_s3] ss:$0 sm:$0xff] }
 0x121   :  { %v749_v10 = vadd.f32 %v748_v6, %v686_v3  ;;  %v1067_v11 = vpop.f32.mrb[32].mxu0 }
 0x122   :  { %v529_v12 = vpop.f32.mrb[33].mxu0  ;;  %v690_v22 = vmax.f32 %v1067_v11, 0.0 }
 0x123   :  { %v750_v13 = vadd.f32 %v749_v10, %v687_v9  ;;  %v1068_v14 = vpop.f32.mrb[34].mxu0  ;;  %v688_v17 = vmax.f32 %v529_v12, 0.0  ;;  %v709_v10 = vmax.f32 %v1479_v28, 0.0  ;;  %v716_v28 = vmax.f32 %v1491_v0, 0.0 }
 0x124   :  { %v532_v16 = vpop.f32.mrb[35].mxu0  ;;  %v691_v27 = vmax.f32 %v1068_v14, 0.0 }
 0x125   :  { %v689_v19 = vmax.f32 %v532_v16, 0.0  ;;  %v713_v16 = vmax.f32 %v1487_v48, 0.0 }
 0x127   :  { %v757_v26 = vadd.f32 %v689_v19, %v688_v17 }
 0x129   :  { %v758_v29 = vadd.f32 %v757_v26, %v690_v22  ;;  %v751_v22 = vrot.slane %v750_v13, 4 }
 0x12b   :  { %v759_v31 = vadd.f32 %v758_v29, %v691_v27  ;;  %v752_v27 = vadd.f32 %v751_v22, %v750_v13 }
 0x12d   :  { %v760_v32 = vadd.f32 %v759_v31, %v692_v30  ;;  %v719_v30 = vmax.f32 %v1493_v2, 0.0  ;;  %v753_v31 = vrot.slane %v752_v27, 2 }
 0x12f   :  { %v761_v38 = vadd.f32 %v760_v32, %v693_v34  ;;  %v754_v34 = vadd.f32 %v753_v31, %v752_v27 }
 0x131   :  { %v762_v42 = vadd.f32 %v761_v38, %v694_v35  ;;  %v755_v0 = vrot.slane %v754_v34, 1 }
 0x133   :  { %v763_v46 = vadd.f32 %v762_v42, %v695_v39  ;;  %v756_v42 = vadd.f32 %v755_v0, %v754_v34 }
 0x135   :  { %v764_v47 = vadd.f32 %v763_v46, %v696_v43 }
 0x137   :  { %v765_v54 = vadd.f32 %v764_v47, %v697_v50 }
 0x139   :  { %v766_v55 = vadd.f32 %v765_v54, %v698_v51 }
 0x13b   :  { %v767_v57 = vadd.f32 %v766_v55, %v699_v20 }
 0x13d   :  { %v768_v15 = vadd.f32 %v767_v57, %v700_v24 }
 0x13f   :  { %v769_v59 = vadd.f32 %v768_v15, %v701_v58 }
 0x141   :  { %v770_v60 = vadd.f32 %v769_v59, %v702_v21 }
 0x143   :  { %v771_v62 = vadd.f32 %v770_v60, %v703_v36 }
 0x145   :  { %v772_v33 = vadd.f32 %v771_v62, %v704_v40 }
 0x147   :  { %v773_v3 = vadd.f32 %v772_v33, %v705_v63 }
 0x149   :  { %v774_v6 = vadd.f32 %v773_v3, %v706_v37 }
 0x14b   :  { %v775_v9 = vadd.f32 %v774_v6, %v707_v52 }
 0x14d   :  { %v776_v49 = vadd.f32 %v775_v9, %v708_v56 }
 0x14f   :  { %v777_v11 = vadd.f32 %v776_v49, %v709_v10 }
 0x151   :  { %v778_v12 = vadd.f32 %v777_v11, %v710_v53 }
 0x153   :  { %v779_v14 = vadd.f32 %v778_v12, %v711_v4 }
 0x155   :  { %v780_v1 = vadd.f32 %v779_v14, %v712_v8 }
 0x157   :  { %v781_v17 = vadd.f32 %v780_v1, %v713_v16 }
 0x159   :  { %v782_v19 = vadd.f32 %v781_v17, %v714_v5 }
 0x15b   :  { %v783_v18 = vadd.f32 %v782_v19, %v715_v23 }
 0x15d   :  { %v784_v26 = vadd.f32 %v783_v18, %v716_v28 }
 0x15f   :  { %v785_v29 = vadd.f32 %v784_v26, %v717_v25 }
 0x161   :  { %v786_v48 = vadd.f32 %v785_v29, %v718_v44 }
 0x163   :  { %v787_v41 = vadd.f32 %v786_v48, %v719_v30 }
 0x165   :  { %v788_v32 = vrot.slane %v787_v41, 4 }
 0x167   :  { %v789_v45 = vadd.f32 %v788_v32, %v787_v41 }
 0x169   :  { %v790_v35 = vrot.slane %v789_v45, 2 }
 0x16b   :  { %v791_v38 = vadd.f32 %v790_v35, %v789_v45 }
 0x16d   :  { %v792_v39 = vrot.slane %v791_v38, 1 }
 0x16f   :  { %v793_v43 = vadd.f32 %v792_v39, %v791_v38 }
 0x171   :  { %v820_v7 = vsel %vm819_vm4, %v793_v43, %v756_v42 }
 0x172   :  { %1130 = vmatmul.mubr.f32.vlgmr.msra.gmra.mrb[28].mxu1 %v820_v7 }
 0x245   :  { %v888_v2 = vpop.f32.mrb[28].mxu1 }
 0x246   :  { %v889_v13 = vadd.f32 %v974_v61, %v888_v2  ;;  %v1131_v46 = vpop.f32.mrb[29].mxu1 }
 0x248   :  { %892 = vst [vmem:[#allocation2] sm:$0x3] %v889_v13 }
 0x249   :  { %1213 = shalt.err (!%p1210_p4)
}
 0x24a   :  { %s1214_s13 = scalar_lea.hbm %s1544_s4, 32 }
 0x24b   :  { %p1215_p5 = scmp.ne.s32.totalorder %s1544_s4, %s1214_s13  ;;  %p1218_p6 = scmp.lt.u32.totalorder %s1214_s13, %s1544_s4 }
 0x24d   :  { %p1220_p7 = pnand %p1218_p6, %p1215_p5 }
 0x24f   :  { %1223 = shalt.err (!%p1220_p7)
}
 0x250   :  { %902 = dma.vmem_to_hbm [thread:$0]  %s900_s0, 32, %s1544_s4, [#allocation3]  }
 0x251   :  { %1224 = dma.done.wait [#allocation3], 32  }
 0x252   :  { %1225 = vsyncadd [#allocation3], 4294967264 }
 0x253   :  { %906 = vsyncpa [#allocation3], 1 }

</bundles_post_ra>
